<compile_context>
chip_gen: v7x
topology: tpu7x:2x2x1
jax: 0.10.0
libtpu: 0.0.40
codegen_flags: <defaults>
</compile_context>

<pallas_src>
import jax
import jax.numpy as jnp
from jax.experimental import pallas as pl
from jax.experimental.pallas import tpu as pltpu  # noqa: F401  (TPU backend)

B, D, H = 2, 8, 32          # batch, task-space dim, hidden width
EPS = 0.1                   # metric regularizer -> M is SPD, so pinv(M) == inv(M)
NS_ITERS = 14               # Newton-Schulz steps (quadratic convergence, see init)


# ---------------------------------------------------------------------------
# kernel math
# ---------------------------------------------------------------------------
def _bmm_vpu(a, b, d):
    """Batched (B,d,d)@(B,d,d) as d unrolled broadcast-multiply-accumulates.

    Keeps the tiny d=8 matmuls on the VPU; on the MXU each one would occupy a
    full 128/256-wide systolic push plus a serial result-FIFO pop at <1%
    array utilization."""
    acc = a[:, :, 0:1] * b[:, 0:1, :]
    for k in range(1, d):
        acc = acc + a[:, :, k:k + 1] * b[:, k:k + 1, :]
    return acc


def _natural_math(x, xd, w1, w2, b1, w3, b3, s, eye_flat):
    """Synthetic RMP natural form (f, M_flat).

    M[b] = Wj diag(h[b]^2) Wj^T + EPS*I is computed as a single lane-dense
    matmul (h*h) @ S with S[h, i*D+j] = Wj[i,h]*Wj[j,h] precomputed outside."""
    h = jnp.tanh(jnp.dot(x, w1, preferred_element_type=jnp.float32)
                 + jnp.dot(xd, w2, preferred_element_type=jnp.float32)
                 + b1)                                            # (B, H)
    f = jnp.dot(h, w3, preferred_element_type=jnp.float32) + b3   # (B, D)
    m_flat = (jnp.dot(h * h, s, preferred_element_type=jnp.float32)
              + EPS * eye_flat)                                   # (B, D*D)
    return f, m_flat


def _resolve_math(m_flat, f, eye_flat, b, d):
    """xdd = pinv(M) @ f for SPD M via Newton-Schulz, whole batch, VPU only."""
    # TODO(synk): torch.pinverse is SVD-based; no SVD in Pallas. M is SPD here
    # (EPS*I regularization), so pinv == inv and Newton-Schulz converges to it.
    m = m_flat.reshape(b, d, d)
    eye3 = eye_flat.reshape(1, d, d)
    # n = ||M||_inf per batch element (>= lambda_max).  X0 = 2/(n+EPS) * I gives
    # spectral radius of (I - X0 M) <= (n-EPS)/(n+EPS) < 1 -> quadratic convergence;
    # 14 doublings drive the error far below f32 precision for this metric.
    n = jnp.max(jnp.sum(jnp.abs(m), axis=-1, keepdims=True), axis=-2, keepdims=True)
    x = (2.0 / (n + EPS)) * eye3                                  # (B, d, d)
    for _ in range(NS_ITERS):
        mx = _bmm_vpu(m, x, d)
        x = 2.0 * x - _bmm_vpu(x, mx, d)                          # X (2I - M X)
    # X == inv(M); xdd[b,i] = sum_j X[b,i,j] * f[b,j]
    return jnp.sum(x * f[:, None, :], axis=-1)                    # (B, d)


# ---------------------------------------------------------------------------
# kernels
# ---------------------------------------------------------------------------
def _natural_kernel(x_ref, xd_ref, w1_ref, w2_ref, b1_ref, w3_ref, b3_ref,
                    s_ref, eye_ref, f_ref, m_ref):
    f, m_flat = _natural_math(x_ref[...], xd_ref[...], w1_ref[...], w2_ref[...],
                              b1_ref[...], w3_ref[...], b3_ref[...],
                              s_ref[...], eye_ref[...])
    f_ref[...] = f
    m_ref[...] = m_flat          # lane-dense (B, D*D); reshaped in the wrapper


def _canonical_kernel(x_ref, xd_ref, w1_ref, w2_ref, b1_ref, w3_ref, b3_ref,
                      s_ref, eye_ref, xdd_ref, m_ref):
    """Fused natural form + resolve: single launch, no HBM round trip of (f, M)."""
    eye_flat = eye_ref[...]
    f, m_flat = _natural_math(x_ref[...], xd_ref[...], w1_ref[...], w2_ref[...],
                              b1_ref[...], w3_ref[...], b3_ref[...],
                              s_ref[...], eye_flat)
    m_ref[...] = m_flat
    xdd_ref[...] = _resolve_math(m_flat, f, eye_flat, x_ref.shape[0], D)


# ---------------------------------------------------------------------------
# wrappers / module
# ---------------------------------------------------------------------------
def _derived(params):
    """Parameter-only precompute, hoisted out of the kernels."""
    wjt = params['wjt']                                            # (D, H)
    s = jnp.einsum('ih,jh->hij', wjt, wjt).reshape(H, D * D)       # (H, D*D)
    eye_flat = jnp.eye(D, dtype=jnp.float32).reshape(1, D * D)     # (1, D*D)
    return s, eye_flat


class Rmp:
    """JAX/Pallas port of rmpflow's Rmp with a deterministic synthetic eval_natural."""

    def __init__(self, params, return_natural=True):
        self.params = params
        self.return_natural = return_natural
        self._s, self._eye_flat = _derived(params)

    # -- internal -----------------------------------------------------------
    def _inputs(self, x, xd):
        p = self.params
        return (x, xd, p['w1'], p['w2'], p['b1'], p['w3'], p['b3'],
                self._s, self._eye_flat)

    def _natural_call(self, x, xd):
        b = x.shape[0]
        f, m_flat = pl.pallas_call(
            _natural_kernel,
            out_shape=(jax.ShapeDtypeStruct((b, D), jnp.float32),
                       jax.ShapeDtypeStruct((b, D * D), jnp.float32)),
        )(*self._inputs(x, xd))
        return f, m_flat.reshape(b, D, D)

    def _canonical_call(self, x, xd):
        b = x.shape[0]
        xdd, m_flat = pl.pallas_call(
            _canonical_kernel,
            out_shape=(jax.ShapeDtypeStruct((b, D), jnp.float32),
                       jax.ShapeDtypeStruct((b, D * D), jnp.float32)),
        )(*self._inputs(x, xd))
        return xdd, m_flat.reshape(b, D, D)

    @staticmethod
    def _canonicalize(x, xd):
        if x.ndim == 1:
            x = x.reshape(1, -1)
            if xd is not None and xd.ndim == 1:
                xd = xd.reshape(1, -1)
        if xd is None:
            xd = jnp.zeros_like(x)
        return x, xd

    # -- public API mirroring the torch module ------------------------------
    def eval_natural(self, x, xd, t=None):
        return self._natural_call(x, xd)

    def __call__(self, x, xd=None, t=None):
        x, xd = self._canonicalize(x, xd)
        # torch's .detach() under eval() is a no-op here (inference, no tape).
        if self.return_natural:
            return self._natural_call(x, xd)
        xdd, _ = self._canonical_call(x, xd)   # fused kernel, one launch
        return xdd

    def eval_canonical(self, x, xd, t=None):
        x, xd = self._canonicalize(x, xd)
        return self._canonical_call(x, xd)     # (xdd, M) from one fused kernel


def init_params(key):
    ks = jax.random.split(key, 6)
    s = 0.3
    return dict(
        w1=s * jax.random.normal(ks[0], (D, H), jnp.float32),
        w2=s * jax.random.normal(ks[1], (D, H), jnp.float32),
        b1=s * jax.random.normal(ks[2], (1, H), jnp.float32),
        w3=s * jax.random.normal(ks[3], (H, D), jnp.float32),
        b3=s * jax.random.normal(ks[4], (1, D), jnp.float32),
        wjt=s * jax.random.normal(ks[5], (D, H), jnp.float32),
    )


if __name__ == "__main__":
    key = jax.random.PRNGKey(0)
    kx, kxd, kp = jax.random.split(key, 3)
    x = jax.random.normal(kx, (B, D), jnp.float32)
    xd = jax.random.normal(kxd, (B, D), jnp.float32)
    params = init_params(kp)

    # return_natural=True path (module default): forward -> (f, M)
    rmp = Rmp(params, return_natural=True)
    f, M = rmp(x, xd)
    jax.block_until_ready((f, M))

    # pure-JAX reference of the same synthetic eval_natural
    h = jnp.tanh(x @ params['w1'] + xd @ params['w2'] + params['b1'])
    f_ref = h @ params['w3'] + params['b3']
    Jr = h[:, None, :] * params['wjt'][None, :, :]
    M_ref = jnp.einsum('bdh,bkh->bdk', Jr, Jr) + EPS * jnp.eye(D, dtype=jnp.float32)
    assert jnp.allclose(f, f_ref, atol=1e-4, rtol=1e-4)
    assert jnp.allclose(M, M_ref, atol=1e-4, rtol=1e-4)

    # return_natural=False path: xdd = einsum('bij,bj->bi', pinverse(M), f)
    rmp_canonical = Rmp(params, return_natural=False)
    xdd = rmp_canonical(x, xd)
    jax.block_until_ready(xdd)
    xdd_ref = jnp.einsum('bij,bj->bi', jnp.linalg.pinv(M_ref), f_ref)
    assert jnp.allclose(xdd, xdd_ref, atol=1e-3, rtol=1e-3)

    # eval_canonical path: (xdd, M) from the fused kernel
    xdd2, M2 = rmp.eval_canonical(x, xd)
    jax.block_until_ready((xdd2, M2))
    assert jnp.allclose(xdd2, xdd_ref, atol=1e-3, rtol=1e-3)
    assert jnp.allclose(M2, M_ref, atol=1e-4, rtol=1e-4)

    print("KERNEL_OK")
</pallas_src>

<mosaic_0001>
module attributes {stable_mosaic.version = 11 : i64} {
  func.func @_natural_kernel(%arg0: memref<2x8xf32, #tpu.memory_space<vmem>>, %arg1: memref<2x8xf32, #tpu.memory_space<vmem>>, %arg2: memref<8x32xf32, #tpu.memory_space<vmem>>, %arg3: memref<8x32xf32, #tpu.memory_space<vmem>>, %arg4: memref<1x32xf32, #tpu.memory_space<vmem>>, %arg5: memref<32x8xf32, #tpu.memory_space<vmem>>, %arg6: memref<1x8xf32, #tpu.memory_space<vmem>>, %arg7: memref<32x64xf32, #tpu.memory_space<vmem>>, %arg8: memref<1x64xf32, #tpu.memory_space<vmem>>, %arg9: memref<2x8xf32, #tpu.memory_space<vmem>>, %arg10: memref<2x64xf32, #tpu.memory_space<vmem>>) attributes {dimension_semantics = [], scalar_prefetch = 0 : i64, scratch_operands = 0 : i64, tpu.core_type = #tpu.core_type<tc>} {
    %c0 = arith.constant 0 : index
    %c0_0 = arith.constant 0 : index
    %0 = vector.load %arg0[%c0, %c0_0] : memref<2x8xf32, #tpu.memory_space<vmem>>, vector<2x8xf32>
    %c0_1 = arith.constant 0 : index
    %c0_2 = arith.constant 0 : index
    %1 = vector.load %arg1[%c0_1, %c0_2] : memref<2x8xf32, #tpu.memory_space<vmem>>, vector<2x8xf32>
    %c0_3 = arith.constant 0 : index
    %c0_4 = arith.constant 0 : index
    %2 = vector.load %arg2[%c0_3, %c0_4] : memref<8x32xf32, #tpu.memory_space<vmem>>, vector<8x32xf32>
    %c0_5 = arith.constant 0 : index
    %c0_6 = arith.constant 0 : index
    %3 = vector.load %arg3[%c0_5, %c0_6] : memref<8x32xf32, #tpu.memory_space<vmem>>, vector<8x32xf32>
    %c0_7 = arith.constant 0 : index
    %c0_8 = arith.constant 0 : index
    %4 = vector.load %arg4[%c0_7, %c0_8] : memref<1x32xf32, #tpu.memory_space<vmem>>, vector<1x32xf32>
    %c0_9 = arith.constant 0 : index
    %c0_10 = arith.constant 0 : index
    %5 = vector.load %arg5[%c0_9, %c0_10] : memref<32x8xf32, #tpu.memory_space<vmem>>, vector<32x8xf32>
    %c0_11 = arith.constant 0 : index
    %c0_12 = arith.constant 0 : index
    %6 = vector.load %arg6[%c0_11, %c0_12] : memref<1x8xf32, #tpu.memory_space<vmem>>, vector<1x8xf32>
    %c0_13 = arith.constant 0 : index
    %c0_14 = arith.constant 0 : index
    %7 = vector.load %arg7[%c0_13, %c0_14] : memref<32x64xf32, #tpu.memory_space<vmem>>, vector<32x64xf32>
    %c0_15 = arith.constant 0 : index
    %c0_16 = arith.constant 0 : index
    %8 = vector.load %arg8[%c0_15, %c0_16] : memref<1x64xf32, #tpu.memory_space<vmem>>, vector<1x64xf32>
    %cst = arith.constant dense<0.000000e+00> : vector<2x32xf32>
    %9 = tpu.matmul %0, %2, %cst {dimension_numbers = #tpu.dot_dimension_numbers<[1], [0], [0], [1], [0, 0, 1, 1], [], []>} : vector<2x8xf32>, vector<8x32xf32>, vector<2x32xf32> -> vector<2x32xf32>
    %cst_17 = arith.constant dense<0.000000e+00> : vector<2x32xf32>
    %10 = tpu.matmul %1, %3, %cst_17 {dimension_numbers = #tpu.dot_dimension_numbers<[1], [0], [0], [1], [0, 0, 1, 1], [], []>} : vector<2x8xf32>, vector<8x32xf32>, vector<2x32xf32> -> vector<2x32xf32>
    %11 = arith.addf %9, %10 : vector<2x32xf32>
    %12 = vector.broadcast %4 : vector<1x32xf32> to vector<2x32xf32>
    %13 = arith.addf %11, %12 : vector<2x32xf32>
    %14 = math.tanh %13 : vector<2x32xf32>
    %cst_18 = arith.constant dense<0.000000e+00> : vector<2x8xf32>
    %15 = tpu.matmul %14, %5, %cst_18 {dimension_numbers = #tpu.dot_dimension_numbers<[1], [0], [0], [1], [0, 0, 1, 1], [], []>} : vector<2x32xf32>, vector<32x8xf32>, vector<2x8xf32> -> vector<2x8xf32>
    %16 = vector.broadcast %6 : vector<1x8xf32> to vector<2x8xf32>
    %17 = arith.addf %15, %16 : vector<2x8xf32>
    %18 = arith.mulf %14, %14 : vector<2x32xf32>
    %cst_19 = arith.constant dense<0.000000e+00> : vector<2x64xf32>
    %19 = tpu.matmul %18, %7, %cst_19 {dimension_numbers = #tpu.dot_dimension_numbers<[1], [0], [0], [1], [0, 0, 1, 1], [], []>} : vector<2x32xf32>, vector<32x64xf32>, vector<2x64xf32> -> vector<2x64xf32>
    %cst_20 = arith.constant 1.000000e-01 : f32
    %20 = vector.broadcast %cst_20 : f32 to vector<1x64xf32>
    %21 = arith.mulf %20, %8 : vector<1x64xf32>
    %22 = vector.broadcast %21 : vector<1x64xf32> to vector<2x64xf32>
    %23 = arith.addf %19, %22 : vector<2x64xf32>
    %c0_21 = arith.constant 0 : index
    %c0_22 = arith.constant 0 : index
    %24 = vector.load %arg9[%c0_21, %c0_22] : memref<2x8xf32, #tpu.memory_space<vmem>>, vector<2x8xf32>
    tpu.vector_store %arg9[%c0_21, %c0_22], %17 {strides = array<i32>} : memref<2x8xf32, #tpu.memory_space<vmem>>, vector<2x8xf32>,
    %c0_23 = arith.constant 0 : index
    %c0_24 = arith.constant 0 : index
    %25 = vector.load %arg10[%c0_23, %c0_24] : memref<2x64xf32, #tpu.memory_space<vmem>>, vector<2x64xf32>
    tpu.vector_store %arg10[%c0_23, %c0_24], %23 {strides = array<i32>} : memref<2x64xf32, #tpu.memory_space<vmem>>, vector<2x64xf32>,
    return
  }
}

</mosaic_0001>

<bundles_post_ra>
// kernel: tpu_custom_call.1
= control target key start
LH: loop header
LB: loop body
LE: loop exit
PB: predicated region body
PF: predicated region fallthrough
CT: control target
= control target key end

     0   :  { %16 = vsyncpa [#allocation3], 0  ;;  %v518_v3 = vmov 0.0   ;;  %vm51_vm0 = vcmask 64512   ;;  %s648_s0 = inlined_call_operand.vmem [shape: f32[2,8], index: 0, kind: input, shape index: {}]   ;;  %s649_s1 = inlined_call_operand.vmem [shape: f32[2,8], index: 1, kind: input, shape index: {}]   ;;  %s650_s2 = inlined_call_operand.vmem [shape: f32[8,32], index: 2, kind: input, shape index: {}]   ;;  %s651_s3 = inlined_call_operand.vmem [shape: f32[8,32], index: 3, kind: input, shape index: {}]   ;;  %s652_s4 = inlined_call_operand.vmem [shape: f32[1,32], index: 4, kind: input, shape index: {}]   ;;  %s653_s5 = inlined_call_operand.vmem [shape: f32[32,8], index: 5, kind: input, shape index: {}]   ;;  %s654_s6 = inlined_call_operand.vmem [shape: f32[1,8], index: 6, kind: input, shape index: {}]   ;;  %s655_s7 = inlined_call_operand.vmem [shape: f32[32,64], index: 7, kind: input, shape index: {}]   ;;  %s656_s8 = inlined_call_operand.vmem [shape: f32[1,64], index: 8, kind: input, shape index: {}]   ;;  %s657_s9 = inlined_call_operand.hbm [shape: f32[2,8], index: 9, kind: output, shape index: {0}]   ;;  %s658_s10 = inlined_call_operand.hbm [shape: f32[2,64], index: 10, kind: output, shape index: {1}]  }
   0x1   :  { %v39_v0 = vld [vmem:[%s651_s3] sm:$0xff]  ;;  %419 = vmatprep.subr.mxu0 %v518_v3  ;;  %424 = vmatprep.subr.mxu1 %v518_v3 }
   0x2   :  { %v38_v1 = vld [vmem:[%s650_s2] sm:$0xff] }
   0x3   :  { %v37_v2 = vld [vmem:[%s649_s1] sm:$0x3] }
   0x4   :  { %v36_v4 = vld [vmem:[%s648_s0] sm:$0x3] }
   0x5   :  { %17 = vsyncpa [#allocation5], 0  ;;  %420 = vmatpush3.msra.mxu0 %v39_v0  ;;  %vm519_vm1 = vmmov 0   ;;  %425 = vmatpush3.msra.mxu1 %v38_v1  ;;  %v41_v5 = vld [vmem:[%s653_s5] sm:$0xff]  ;;  %v42_v6 = vld [vmem:[%s653_s5 + $0x8] sm:$0xff]  ;;  %v520_v8 = vmov 0.0|0.0   ;;  %v289_v27 = vlaneseq }
   0x6   :  { %421 = vmatprep.mubr.msk.f32.mxu0 %vm519_vm1, %v518_v3  ;;  %426 = vmatprep.mubr.msk.f32.mxu1 %vm519_vm1, %v518_v3  ;;  %v46_v7 = vld [vmem:[%s655_s7] sm:$0xff]  ;;  %v452_v9 = vpack.c.bf16 %v42_v6, %v41_v5  ;;  %v47_v10 = vld [vmem:[%s655_s7 + $0x8] sm:$0xff]  ;;  %v43_v11 = vld [vmem:[%s653_s5 + $0x10] sm:$0xff]  ;;  %vm212_vm2 = vcmask 261120   ;;  %s521_s16 = smov [#allocation2]   ;;  %vm367_vm3 = vcmask 58368  }
   0x7   :  { %422 = vmatmul.mubr.msk.f32.vlgmr.msra.gmra.mrb[0].mxu0 %vm51_vm0, %v37_v2  ;;  %427 = vmatmul.mubr.msk.f32.vlgmr.msra.gmra.mrb[0].mxu1 %vm51_vm0, %v36_v4  ;;  %v44_v12 = vld [vmem:[%s653_s5 + $0x18] sm:$0xff]  ;;  %v458_v13 = vpack.c.bf16 %v47_v10, %v46_v7  ;;  %v48_v14 = vld [vmem:[%s655_s7 + $0x10] sm:$0xff]  ;;  %v401_v19 = vld [vmem:[%s652_s4] ss:$0 sm:$0xff]  ;;  %v290_v28 = vshrl.u32 %v289_v27, 7  ;;  %s377_s17 = sshll.u32 %s521_s16, 4  ;;  %s378_s17 = int_to_ptr.vmem [resolvable:$true] %s377_s17 }
   0x8   :  { %437 = vmatprep.mubr.msk.f32.mxu0 %vm519_vm1, %v518_v3  ;;  %448 = vmatprep.mubr.msk.f32.mxu1 %vm519_vm1, %v518_v3  ;;  %v49_v15 = vld [vmem:[%s655_s7 + $0x18] sm:$0xff]  ;;  %v455_v16 = vpack.c.bf16 %v44_v12, %v43_v11  ;;  %v50_v29 = vld [vmem:[%s656_s8] sm:$0x1]  ;;  %s522_s18 = smov [#allocation4]   ;;  %vm369_vm4 = vcmask 517120   ;;  %s470_s8 = scalar_lea.vmem %s378_s17, 32 }
   0x9   :  { %451 = vmatprep.subr.bf16.mxu0 %v520_v8  ;;  %457 = vmatprep.subr.bf16.mxu1 %v520_v8  ;;  %v461_v17 = vpack.c.bf16 %v49_v15, %v48_v14  ;;  %v287_v30 = vmul.f32 0.1, %v50_v29  ;;  %v291_v31 = vsub.s32 0, %v290_v28  ;;  %v402_v32 = vld [vmem:[%s654_s6] ss:$0 sm:$0xff]  ;;  %s387_s19 = sshll.u32 %s522_s18, 4  ;;  %p471_p0 = scmp.ne.s32.totalorder %s378_s17, %s470_s8  ;;  %s388_s19 = int_to_ptr.vmem [resolvable:$true] %s387_s19 }
   0xa   :  { %453 = vmatpush3.bf16.msra.mxu0 %v452_v9  ;;  %459 = vmatpush3.bf16.msra.mxu1 %v458_v13  ;;  %p475_p1 = scmp.lt.s32.totalorder %s378_s17, %s378_s17  ;;  %p476_p2 = scmp.lt.s32.totalorder %s470_s8, %s470_s8 }
   0xb   :  { %454 = vmatprep.subr.bf16.mxu0 %v520_v8  ;;  %460 = vmatprep.subr.bf16.mxu1 %v520_v8  ;;  %v292_v33 = vrot.slane %v287_v30, %v291_v31 }
   0xc   :  { %p477_p3 = por %p476_p2, %p475_p1 }
   0xe   :  { %456 = vmatpush3.bf16.msra.mxu0 %v455_v16  ;;  %462 = vmatpush3.bf16.msra.mxu1 %v461_v17  ;;  %p478_p4 = pnand %p477_p3, %p471_p0 }
  0xda   :  { %v121_v18 = vpop.f32.mrb[0].mxu0  ;;  %v194_v20 = vpop.f32.mrb[0].mxu1 }
  0xdb   :  { %v195_v21 = vadd.f32 %v194_v20, %v121_v18  ;;  %v423_v22 = vpop.f32.mrb[1].mxu0  ;;  %v428_v23 = vpop.f32.mrb[1].mxu1 }
  0xdd   :  { %v204_v24 = vadd.f32 %v401_v19, %v195_v21 }
  0xdf   :  { %468 = vtanh.f32 %v204_v24 }
  0xe9   :  { %v469_v25 = vpop.eup %468 }
  0xea   :  { %438 = vmatmul.mubr.msk.f32.vlgmr.msra.gmra.mrb[2].mxu0 %vm212_vm2, %v469_v25  ;;  %v286_v26 = vmul.f32 %v469_v25, %v469_v25 }
  0xec   :  { %449 = vmatmul.mubr.msk.f32.vlgmr.msra.gmra.mrb[2].mxu1 %vm212_vm2, %v286_v26 }
 0x1bd   :  { %v282_v34 = vpop.f32.mrb[2].mxu0 }
 0x1be   :  { %v283_v35 = vadd.f32 %v402_v32, %v282_v34  ;;  %v439_v36 = vpop.f32.mrb[3].mxu0 }
 0x1bf   :  { %v363_v37 = vpop.f32.mrb[2].mxu1 }
 0x1c0   :  { %v364_v38 = vadd.f32 %v363_v37, %v292_v33  ;;  %v450_v39 = vpop.f32.mrb[3].mxu1  ;;  %368 = vst.msk [vmem:[#allocation2] sm:$0x3] %vm367_vm3, %v283_v35 }
 0x1c1   :  { %481 = shalt.err (!%p478_p4)
}
 0x1c2   :  { %s482_s2 = scalar_lea.hbm %s657_s9, 32 }
 0x1c3   :  { %p483_p5 = scmp.ne.s32.totalorder %s657_s9, %s482_s2  ;;  %p486_p6 = scmp.lt.u32.totalorder %s482_s2, %s657_s9 }
 0x1c5   :  { %p488_p7 = pnand %p486_p6, %p483_p5 }
 0x1c7   :  { %491 = shalt.err (!%p488_p7)
}
 0x1c8   :  { %380 = dma.vmem_to_hbm [thread:$0]  %s378_s17, 32, %s657_s9, [#allocation3]   ;;  %370 = vst.msk [vmem:[#allocation4] sm:$0x3] %vm369_vm4, %v364_v38 }
 0x1c9   :  { %s492_s24 = scalar_lea.vmem %s388_s19, 32  ;;  %p497_p9 = scmp.lt.s32.totalorder %s388_s19, %s388_s19 }
 0x1ca   :  { %p493_p8 = scmp.ne.s32.totalorder %s388_s19, %s492_s24  ;;  %p498_p10 = scmp.lt.s32.totalorder %s492_s24, %s492_s24 }
 0x1cc   :  { %p499_p11 = por %p498_p10, %p497_p9 }
 0x1ce   :  { %p500_p12 = pnand %p499_p11, %p493_p8 }
 0x1d0   :  { %503 = shalt.err (!%p500_p12)
}
 0x1d1   :  { %s504_s27 = scalar_lea.hbm %s658_s10, 32 }
 0x1d2   :  { %p505_p13 = scmp.ne.s32.totalorder %s658_s10, %s504_s27  ;;  %p508_p0 = scmp.lt.u32.totalorder %s504_s27, %s658_s10 }
 0x1d4   :  { %p510_p1 = pnand %p508_p0, %p505_p13 }
 0x1d6   :  { %513 = shalt.err (!%p510_p1)
}
 0x1d7   :  { %390 = dma.vmem_to_hbm [thread:$0]  %s388_s19, 32, %s658_s10, [#allocation5]  }
 0x1d8   :  { %514 = dma.done.wait [#allocation3], 32  }
 0x1d9   :  { %515 = vsyncadd [#allocation3], 4294967264 }
 0x1da   :  { %516 = dma.done.wait [#allocation5], 32  }
 0x1db   :  { %517 = vsyncadd [#allocation5], 4294967264 }
 0x1dc   :  { %397 = vsyncpa [#allocation3], 1 }
 0x1dd   :  { %398 = vsyncpa [#allocation5], 1 }

</bundles_post_ra>
